<compile_context>
chip_gen: v6e
topology: v6e:2x2x1
jax: 0.10.0
libtpu: 0.0.40
codegen_flags: <defaults>
</compile_context>

<pallas_src>
import functools

import jax
import jax.numpy as jnp
from jax.experimental import pallas as pl
from jax.experimental.pallas import tpu as pltpu


def _ffn_kernel(x_ref, scale_ref, wa_ref, wg_ref, wd_ref, o_ref,
                xn_ref, acc_ref, *, eps):
    k = pl.program_id(1)
    nt = (((1,), (1,)), ((), ()))   # contract last dims of both operands

    # --- per-token-tile init: RMSNorm (f32) + zero the accumulator ---------
    @pl.when(k == 0)
    def _init():
        xf = x_ref[...].astype(jnp.float32)                       # [TM, dim]
        mean_sq = jnp.mean(xf * xf, axis=-1, keepdims=True)       # [TM, 1]
        s = scale_ref[...].astype(jnp.float32) * jax.lax.rsqrt(mean_sq + eps)
        xn_ref[...] = x_ref[...] * s.astype(x_ref.dtype)          # matches torch
        acc_ref[...] = jnp.zeros_like(acc_ref)

    # --- LinearSwiGLU on this hidden chunk (weights in PyTorch layout) -----
    xn = xn_ref[...].astype(wa_ref.dtype)                          # [TM, dim]
    a = jax.lax.dot_general(xn, wa_ref[...], nt,
                            preferred_element_type=jnp.float32)    # [TM, tk]
    g = jax.lax.dot_general(xn, wg_ref[...], nt,
                            preferred_element_type=jnp.float32)    # [TM, tk]
    act = a * (g * jax.nn.sigmoid(g))                              # silu gate, f32

    # --- down projection chunk, accumulated in f32 -------------------------
    acc_ref[...] += jax.lax.dot_general(
        act.astype(wd_ref.dtype), wd_ref[...], nt,
        preferred_element_type=jnp.float32)                        # [TM, dim]

    # --- finalize: residual add in f32, cast once --------------------------
    @pl.when(k == pl.num_programs(1) - 1)
    def _finalize():
        o_ref[...] = (acc_ref[...]
                      + x_ref[...].astype(jnp.float32)).astype(o_ref.dtype)


def _round_up(a, m):
    return ((a + m - 1) // m) * m


def feed_forward_pallas(x, scale, w_up, w_down, *, eps=1e-6,
                        tile_m=256, tile_k=512, weight_dtype=None,
                        vmem_limit_bytes=None):
    """x: [..., dim]; scale: [dim]; w_up: [2*hidden, dim]; w_down: [dim, hidden]."""
    orig_shape = x.shape
    dim = orig_shape[-1]
    hidden = w_down.shape[1]
    assert w_up.shape == (2 * hidden, dim)
    assert w_down.shape == (dim, hidden)

    x2d = x.reshape(-1, dim)
    n = x2d.shape[0]

    # --- tile sizes (MXU-friendly; ragged extents handled by zero padding) --
    sub = 16 if x.dtype == jnp.bfloat16 else 8          # sublane granularity
    tm = min(_round_up(tile_m, sub), _round_up(n, sub))
    n_pad = _round_up(n, tm)
    tk = min(_round_up(tile_k, 128), _round_up(hidden, 128))   # 128-mult (v5e ok)
    h_pad = _round_up(hidden, tk)

    if n_pad != n:
        x2d = jnp.pad(x2d, ((0, n_pad - n), (0, 0)))

    # Split SwiGLU halves; zero-pad the hidden axis (zero rows/cols contribute
    # nothing to the accumulator).  In production this split / dtype cast is a
    # one-time weight-load transform, not a per-call cost.
    w_dtype = w_up.dtype if weight_dtype is None else weight_dtype
    w_a = w_up[:hidden].astype(w_dtype)
    w_g = w_up[hidden:].astype(w_dtype)
    w_d = w_down.astype(w_dtype)
    if h_pad != hidden:
        w_a = jnp.pad(w_a, ((0, h_pad - hidden), (0, 0)))
        w_g = jnp.pad(w_g, ((0, h_pad - hidden), (0, 0)))
        w_d = jnp.pad(w_d, ((0, 0), (0, h_pad - hidden)))
    scale2d = scale.reshape(1, dim)

    grid = (n_pad // tm, h_pad // tk)

    # --- VMEM budget (double-buffered blocks + scratch + f32 intermediates) -
    bx = jnp.dtype(x.dtype).itemsize
    bw = jnp.dtype(w_dtype).itemsize
    est = (2 * (2 * tm * dim * bx           # x tile + out tile
                + 2 * tk * dim * bw         # w_a + w_gate chunks
                + dim * tk * bw             # w_down chunk
                + dim * 4)                  # scale
           + tm * dim * bx                  # xn scratch
           + tm * dim * 4                   # f32 accumulator
           + 3 * tm * tk * 4)               # a / gate / act intermediates
    if vmem_limit_bytes is None:
        vmem_limit_bytes = min(max(32 * 1024 * 1024, int(est * 1.25)),
                               128 * 1024 * 1024)

    cost = pl.CostEstimate(
        flops=int(6 * n * dim * hidden),                 # up (4NDH) + down (2NDH)
        transcendentals=int(n * hidden),                 # sigmoid
        bytes_accessed=int(2 * n * dim * bx              # read x, write out
                           + grid[0] * 3 * hidden * dim * bw   # streamed weights
                           + dim * 4),
    )

    kernel = functools.partial(_ffn_kernel, eps=eps)

    out = pl.pallas_call(
        kernel,
        out_shape=jax.ShapeDtypeStruct((n_pad, dim), x.dtype),
        grid_spec=pltpu.PrefetchScalarGridSpec(
            num_scalar_prefetch=0,
            grid=grid,
            in_specs=[
                pl.BlockSpec((tm, dim), lambda i, k: (i, 0)),   # x (reused over k)
                pl.BlockSpec((1, dim), lambda i, k: (0, 0)),    # rmsnorm scale
                pl.BlockSpec((tk, dim), lambda i, k: (k, 0)),   # w_a chunk
                pl.BlockSpec((tk, dim), lambda i, k: (k, 0)),   # w_gate chunk
                pl.BlockSpec((dim, tk), lambda i, k: (0, k)),   # w_down chunk
            ],
            out_specs=pl.BlockSpec((tm, dim), lambda i, k: (i, 0)),
            scratch_shapes=[
                pltpu.VMEM((tm, dim), x.dtype),       # normalized activations
                pltpu.VMEM((tm, dim), jnp.float32),   # down-projection accumulator
            ],
        ),
        compiler_params=pltpu.CompilerParams(
            dimension_semantics=("parallel", "arbitrary"),
            vmem_limit_bytes=vmem_limit_bytes,
        ),
        cost_estimate=cost,
    )(x2d, scale2d, w_a, w_g, w_d)

    return out[:n].reshape(orig_shape)


def feed_forward_ref(x, scale, w_up, w_down, eps=1e-6):
    """Pure-JAX reference mirroring the PyTorch module."""
    skip = x
    xf = x.astype(jnp.float32)
    mean_sq = jnp.mean(xf * xf, axis=-1, keepdims=True)
    s = scale.astype(jnp.float32) * jax.lax.rsqrt(mean_sq + eps)
    xn = x * s.astype(x.dtype)
    h = xn @ w_up.T
    hidden = w_down.shape[1]
    a, gate = h[..., :hidden], h[..., hidden:]
    act = a * (gate * jax.nn.sigmoid(gate))
    y = act @ w_down.T
    return y + skip


if __name__ == "__main__":
    key = jax.random.PRNGKey(0)
    kx, kup, kdown, kx2 = jax.random.split(key, 4)

    batch, seq, dim, hidden = 2, 8, 128, 256
    x = jax.random.normal(kx, (batch, seq, dim), dtype=jnp.float32)
    scale = jnp.ones((dim,), dtype=jnp.float32)                 # RMSNorm init
    bound = 1.0 / (dim ** 0.5)
    w_up = jax.random.uniform(kup, (2 * hidden, dim), jnp.float32, -bound, bound)
    # NOTE: the module zero-inits `down`; use small nonzero values so the full
    # path (down projection + residual) is actually exercised.
    w_down = jax.random.uniform(kdown, (dim, hidden), jnp.float32, -0.02, 0.02)

    # 1) fp32; tile_k=128 forces >1 step on the hidden grid axis (accumulator
    #    init/accumulate/finalize path is exercised).
    out = jax.block_until_ready(
        feed_forward_pallas(x, scale, w_up, w_down, tile_k=128))
    ref = feed_forward_ref(x, scale, w_up, w_down)
    assert jnp.allclose(out, ref, atol=1e-4, rtol=1e-4), "fp32 mismatch"

    # 2) ragged token count (n=5) -> exercises the token-padding path.
    xr = jax.random.normal(kx2, (1, 5, dim), dtype=jnp.float32)
    out_r = jax.block_until_ready(feed_forward_pallas(xr, scale, w_up, w_down))
    ref_r = feed_forward_ref(xr, scale, w_up, w_down)
    assert jnp.allclose(out_r, ref_r, atol=1e-4, rtol=1e-4), "ragged mismatch"

    # 3) bf16 activations + bf16 weights (MXU-native dtype), loose tolerance
    #    against the fp32 reference.
    xb = x.astype(jnp.bfloat16)
    out_b = jax.block_until_ready(
        feed_forward_pallas(xb, scale.astype(jnp.bfloat16), w_up, w_down,
                            weight_dtype=jnp.bfloat16))
    err = jnp.max(jnp.abs(out_b.astype(jnp.float32) - ref))
    assert err < 0.1, f"bf16 mismatch (max abs err {err})"

    print("KERNEL_OK")
</pallas_src>

<mosaic_0001>
module attributes {stable_mosaic.version = 11 : i64} {
  func.func @_ffn_kernel(%arg0: i32, %arg1: i32, %arg2: memref<16x128xf32, #tpu.memory_space<vmem>>, %arg3: memref<1x128xf32, #tpu.memory_space<vmem>>, %arg4: memref<128x128xf32, #tpu.memory_space<vmem>>, %arg5: memref<128x128xf32, #tpu.memory_space<vmem>>, %arg6: memref<128x128xf32, #tpu.memory_space<vmem>>, %arg7: memref<16x128xf32, #tpu.memory_space<vmem>>, %arg8: memref<16x128xf32, #tpu.memory_space<vmem>>, %arg9: memref<16x128xf32, #tpu.memory_space<vmem>>) attributes {dimension_semantics = [#tpu.dimension_semantics<parallel>, #tpu.dimension_semantics<arbitrary>], iteration_bounds = array<i64: 1, 2>, scalar_prefetch = 0 : i64, scratch_operands = 2 : i64, tpu.core_type = #tpu.core_type<tc>, window_params = [{transform_indices = @transform_0, window_bounds = array<i64: 16, 128>}, {pipeline_mode = #tpu.pipeline_mode<synchronous>, transform_indices = @transform_1, window_bounds = array<i64: 1, 128>}, {transform_indices = @transform_2, window_bounds = array<i64: 128, 128>}, {transform_indices = @transform_3, window_bounds = array<i64: 128, 128>}, {transform_indices = @transform_4, window_bounds = array<i64: 128, 128>}, {transform_indices = @transform_5, window_bounds = array<i64: 16, 128>}]} {
    %c0_i32 = arith.constant 0 : i32
    %0 = arith.cmpi eq, %arg1, %c0_i32 : i32
    %1 = arith.extui %0 : i1 to i32
    %c0_i32_0 = arith.constant 0 : i32
    %2 = arith.cmpi ne, %1, %c0_i32_0 : i32
    scf.if %2 {
      %c0_16 = arith.constant 0 : index
      %c0_17 = arith.constant 0 : index
      %23 = vector.load %arg2[%c0_16, %c0_17] : memref<16x128xf32, #tpu.memory_space<vmem>>, vector<16x128xf32>
      %24 = arith.mulf %23, %23 : vector<16x128xf32>
      %cst_18 = arith.constant dense<0.000000e+00> : vector<16xf32>
      %25 = vector.multi_reduction <add>, %24, %cst_18 [1] : vector<16x128xf32> to vector<16xf32>
      %26 = vector.shape_cast %25 : vector<16xf32> to vector<16x1xf32>
      %cst_19 = arith.constant 1.280000e+02 : f32
      %27 = vector.broadcast %cst_19 : f32 to vector<16x1xf32>
      %28 = arith.divf %26, %27 : vector<16x1xf32>
      %c0_20 = arith.constant 0 : index
      %c0_21 = arith.constant 0 : index
      %29 = vector.load %arg3[%c0_20, %c0_21] : memref<1x128xf32, #tpu.memory_space<vmem>>, vector<1x128xf32>
      %cst_22 = arith.constant 9.99999997E-7 : f32
      %30 = vector.broadcast %cst_22 : f32 to vector<16x1xf32>
      %31 = arith.addf %28, %30 : vector<16x1xf32>
      %32 = math.rsqrt %31 : vector<16x1xf32>
      %33 = vector.broadcast %29 : vector<1x128xf32> to vector<16x128xf32>
      %34 = vector.broadcast %32 : vector<16x1xf32> to vector<16x128xf32>
      %35 = arith.mulf %33, %34 : vector<16x128xf32>
      %c0_23 = arith.constant 0 : index
      %c0_24 = arith.constant 0 : index
      %36 = vector.load %arg2[%c0_23, %c0_24] : memref<16x128xf32, #tpu.memory_space<vmem>>, vector<16x128xf32>
      %37 = arith.mulf %36, %35 : vector<16x128xf32>
      %c0_25 = arith.constant 0 : index
      %c0_26 = arith.constant 0 : index
      %38 = vector.load %arg8[%c0_25, %c0_26] : memref<16x128xf32, #tpu.memory_space<vmem>>, vector<16x128xf32>
      tpu.vector_store %arg8[%c0_25, %c0_26], %37 {strides = array<i32>} : memref<16x128xf32, #tpu.memory_space<vmem>>, vector<16x128xf32>,
      %cst_27 = arith.constant 0.000000e+00 : f32
      %39 = vector.broadcast %cst_27 : f32 to vector<16x128xf32>
      %c0_28 = arith.constant 0 : index
      %c0_29 = arith.constant 0 : index
      %40 = vector.load %arg9[%c0_28, %c0_29] : memref<16x128xf32, #tpu.memory_space<vmem>>, vector<16x128xf32>
      tpu.vector_store %arg9[%c0_28, %c0_29], %39 {strides = array<i32>} : memref<16x128xf32, #tpu.memory_space<vmem>>, vector<16x128xf32>,
    } else {
    }
    %c0 = arith.constant 0 : index
    %c0_1 = arith.constant 0 : index
    %3 = vector.load %arg8[%c0, %c0_1] : memref<16x128xf32, #tpu.memory_space<vmem>>, vector<16x128xf32>
    %c0_2 = arith.constant 0 : index
    %c0_3 = arith.constant 0 : index
    %4 = vector.load %arg4[%c0_2, %c0_3] : memref<128x128xf32, #tpu.memory_space<vmem>>, vector<128x128xf32>
    %cst = arith.constant dense<0.000000e+00> : vector<16x128xf32>
    %5 = tpu.matmul %3, %4, %cst {dimension_numbers = #tpu.dot_dimension_numbers<[1], [1], [0], [0], [0, 0, 1, 0], [], []>} : vector<16x128xf32>, vector<128x128xf32>, vector<16x128xf32> -> vector<16x128xf32>
    %c0_4 = arith.constant 0 : index
    %c0_5 = arith.constant 0 : index
    %6 = vector.load %arg5[%c0_4, %c0_5] : memref<128x128xf32, #tpu.memory_space<vmem>>, vector<128x128xf32>
    %cst_6 = arith.constant dense<0.000000e+00> : vector<16x128xf32>
    %7 = tpu.matmul %3, %6, %cst_6 {dimension_numbers = #tpu.dot_dimension_numbers<[1], [1], [0], [0], [0, 0, 1, 0], [], []>} : vector<16x128xf32>, vector<128x128xf32>, vector<16x128xf32> -> vector<16x128xf32>
    %8 = arith.negf %7 : vector<16x128xf32>
    %9 = math.exp %8 : vector<16x128xf32>
    %cst_7 = arith.constant 1.000000e+00 : f32
    %10 = vector.broadcast %cst_7 : f32 to vector<16x128xf32>
    %11 = arith.addf %10, %9 : vector<16x128xf32>
    %12 = arith.divf %10, %11 : vector<16x128xf32>
    %13 = arith.mulf %7, %12 : vector<16x128xf32>
    %14 = arith.mulf %5, %13 : vector<16x128xf32>
    %c0_8 = arith.constant 0 : index
    %c0_9 = arith.constant 0 : index
    %15 = vector.load %arg9[%c0_8, %c0_9] : memref<16x128xf32, #tpu.memory_space<vmem>>, vector<16x128xf32>
    %c0_10 = arith.constant 0 : index
    %c0_11 = arith.constant 0 : index
    %16 = vector.load %arg6[%c0_10, %c0_11] : memref<128x128xf32, #tpu.memory_space<vmem>>, vector<128x128xf32>
    %cst_12 = arith.constant dense<0.000000e+00> : vector<16x128xf32>
    %17 = tpu.matmul %14, %16, %cst_12 {dimension_numbers = #tpu.dot_dimension_numbers<[1], [1], [0], [0], [0, 0, 1, 0], [], []>} : vector<16x128xf32>, vector<128x128xf32>, vector<16x128xf32> -> vector<16x128xf32>
    %18 = arith.addf %15, %17 : vector<16x128xf32>
    %c0_13 = arith.constant 0 : index
    %c0_14 = arith.constant 0 : index
    %19 = vector.load %arg9[%c0_13, %c0_14] : memref<16x128xf32, #tpu.memory_space<vmem>>, vector<16x128xf32>
    tpu.vector_store %arg9[%c0_13, %c0_14], %18 {strides = array<i32>} : memref<16x128xf32, #tpu.memory_space<vmem>>, vector<16x128xf32>,
    %c1_i32 = arith.constant 1 : i32
    %20 = arith.cmpi eq, %arg1, %c1_i32 : i32
    %21 = arith.extui %20 : i1 to i32
    %c0_i32_15 = arith.constant 0 : i32
    %22 = arith.cmpi ne, %21, %c0_i32_15 : i32
    scf.if %22 {
      %c0_16 = arith.constant 0 : index
      %c0_17 = arith.constant 0 : index
      %23 = vector.load %arg9[%c0_16, %c0_17] : memref<16x128xf32, #tpu.memory_space<vmem>>, vector<16x128xf32>
      %c0_18 = arith.constant 0 : index
      %c0_19 = arith.constant 0 : index
      %24 = vector.load %arg2[%c0_18, %c0_19] : memref<16x128xf32, #tpu.memory_space<vmem>>, vector<16x128xf32>
      %25 = arith.addf %23, %24 : vector<16x128xf32>
      %c0_20 = arith.constant 0 : index
      %c0_21 = arith.constant 0 : index
      %26 = vector.load %arg7[%c0_20, %c0_21] : memref<16x128xf32, #tpu.memory_space<vmem>>, vector<16x128xf32>
      tpu.vector_store %arg7[%c0_20, %c0_21], %25 {strides = array<i32>} : memref<16x128xf32, #tpu.memory_space<vmem>>, vector<16x128xf32>,
    } else {
    }
    return
  }
  func.func @transform_0(%arg0: i32, %arg1: i32) -> (i32, i32) {
    %c0_i32 = arith.constant 0 : i32
    %c0_i32_0 = arith.constant 0 : i32
    return %arg0, %c0_i32 : i32, i32
  }
  func.func @transform_1(%arg0: i32, %arg1: i32) -> (i32, i32) {
    %c0_i32 = arith.constant 0 : i32
    %c0_i32_0 = arith.constant 0 : i32
    %c0_i32_1 = arith.constant 0 : i32
    return %c0_i32, %c0_i32_0 : i32, i32
  }
  func.func @transform_2(%arg0: i32, %arg1: i32) -> (i32, i32) {
    %c0_i32 = arith.constant 0 : i32
    %c0_i32_0 = arith.constant 0 : i32
    return %arg1, %c0_i32 : i32, i32
  }
  func.func @transform_3(%arg0: i32, %arg1: i32) -> (i32, i32) {
    %c0_i32 = arith.constant 0 : i32
    %c0_i32_0 = arith.constant 0 : i32
    return %arg1, %c0_i32 : i32, i32
  }
  func.func @transform_4(%arg0: i32, %arg1: i32) -> (i32, i32) {
    %c0_i32 = arith.constant 0 : i32
    %c0_i32_0 = arith.constant 0 : i32
    return %c0_i32, %arg1 : i32, i32
  }
  func.func @transform_5(%arg0: i32, %arg1: i32) -> (i32, i32) {
    %c0_i32 = arith.constant 0 : i32
    %c0_i32_0 = arith.constant 0 : i32
    return %arg0, %c0_i32 : i32, i32
  }
}

</mosaic_0001>

<bundles_post_ra>
// kernel: tpu_custom_call.1
= control target key start
LH: loop header
LB: loop body
LE: loop exit
PB: predicated region body
PF: predicated region fallthrough
CT: control target
= control target key end

     0   :  { %s1606_s0 = inlined_call_operand.hbm [shape: f32[16,128], index: 0, kind: input, shape index: {}]   ;;  %s1607_s1 = inlined_call_operand.vmem [shape: f32[1,128], index: 1, kind: input, shape index: {}]   ;;  %s1608_s2 = inlined_call_operand.hbm [shape: f32[256,128], index: 2, kind: input, shape index: {}]   ;;  %s1609_s3 = inlined_call_operand.hbm [shape: f32[256,128], index: 3, kind: input, shape index: {}]   ;;  %s1610_s4 = inlined_call_operand.hbm [shape: f32[128,256], index: 4, kind: input, shape index: {}]   ;;  %s1611_s5 = inlined_call_operand.hbm [shape: f32[16,128], index: 5, kind: output, shape index: {}]  }
   0x1   :  { %1612 = sst [smem:[#allocation17_spill]] %s1608_s2 }
   0x2   :  { %1613 = sst [smem:[#allocation18_spill]] %s1609_s3 }
   0x3   :  { %10 = vsyncpa [#allocation5], 0 }
   0x4   :  { %11 = vsyncpa [#allocation8], 0 }
   0x5   :  { %13 = vsyncpa [#allocation8 + $0x1], 0 }
   0x6   :  { %14 = vsyncpa [#allocation11], 0 }
   0x7   :  { %16 = vsyncpa [#allocation11 + $0x1], 0 }
   0x8   :  { %17 = vsyncpa [#allocation6], 0  ;;  %s1351_s18 = smov 0   ;;  %s1353_s19 = smov 0  }
   0x9   :  { %s1355_s20 = smov 0   ;;  %s1357_s21 = smov 0  }
   0xa   :  { %s1359_s22 = smov 0   ;;  %s1361_s23 = smov 0  }
   0xb LB: > { %s32_s24 = sadd.s32 1, %s1304_s22  ;;  %s89_s25 = sadd.s32 1, %s1296_s20  ;;  %s1308_s23 = sphi %s1361_s23, %s23_s23   ;;  %s1304_s22 = sphi %s1359_s22, %s1625_s22   ;;  %s1300_s21 = sphi %s1357_s21, %s1624_s21   ;;  %s1296_s20 = sphi %s1355_s20, %s1623_s20   ;;  %s1292_s19 = sphi %s1353_s19, %s1622_s19   ;;  %s1288_s18 = sphi %s1351_s18, %s1621_s18  }
   0xc   : > { %p33_p0 = scmp.ge.s32.totalorder %s32_s24, 2  ;;  %p96_p1 = scmp.ne.s32.totalorder %s1296_s20, %s1292_s19 }
   0xd   : > { %p97_p2 = scmp.eq.s32.totalorder %s1308_s23, 0  ;;  %p1040_p5 = scmp.lt.s32.totalorder %s1308_s23, 2 }
   0xe   : > { %s1627_s24 = smov (%p33_p0, %s32_s24), 0  ;;  %s223_s28 = sand.u32 1, %s1308_s23  }
   0xf   : > { %p1388_p3 = por %p97_p2, %p96_p1  ;;  %s86_s27 = ssub.s32 %s1304_s22, %s1627_s24 }
  0x10   : > { %p87_p4 = scmp.eq.s32.totalorder %s86_s27, 0  ;;  %s225_s29 = sand.u32 1, %s1296_s20  }
  0x11   : > { %s1402_s6 = sshll.u32 %s225_s29, 7  ;;  %s850_s7 = sshll.u32 %s1304_s22, 11 }
  0x12   : > { %s1398_s30 = scalar_select %p87_p4, %s1296_s20, %s89_s25  }
  0x13   : > { %s1615_s2 = sld [smem:[#allocation17_spill]]  ;;  %s227_s11 = scalar_lea.vmem [#allocation7], %s1402_s6 }
  0x14   : > { %s234_s12 = sshll.u32 %s227_s11, 4  ;;  %p1411_p6 = pnand %p1040_p5, %p1388_p3  ;;  %s235_s12 = int_to_ptr.vmem [resolvable:$true] %s234_s12 }
  0x15   : > { %s1617_s3 = sld [smem:[#allocation18_spill]]  ;;  %s1420_s17 = scalar_lea.sflag [#allocation8], %s223_s28 }
  0x16   : > { %p1114_p7 = pneg %p1411_p6  ;;  %s1125_s25 = scalar_lea.vmem %s235_s12, 2048 }
  0x17   : > { %p1126_p8 = scmp.ne.s32.totalorder %s235_s12, %s1125_s25  ;;  %s1310_s26 = smov [#allocation7]  }
  0x18   : > { %s1130_s27 = sshll.u32 %s1310_s26, 4  ;;  %s1131_s27 = int_to_ptr.vmem [resolvable:$false] %s1130_s27 }
  0x19   : > { %s233_s10 = scalar_lea.hbm %s1615_s2, %s850_s7  ;;  %p1128_p9 = pnand %p1126_p8, %p1114_p7 }
  0x1a   : > { %s1132_s8 = scalar_lea.vmem %s1131_s27, 4096  ;;  %p1133_p11 = scmp.lt.s32.totalorder %s235_s12, %s1131_s27 }
  0x1b   : > { %s1418_s16 = scalar_lea.hbm %s1617_s3, %s850_s7  ;;  %p1129_p10 = pneg %p1128_p9 }
  0x1c   : > { %p1134_p12 = scmp.lt.s32.totalorder %s1132_s8, %s1125_s25 }
  0x1e   : > { %p1135_p13 = por %p1134_p12, %p1133_p11 }
  0x20   : > { %p1136_p0 = pnand %p1135_p13, %p1129_p10 }
  0x22   : > { %1139 = shalt.err (!%p1136_p0)
}
  0x23   : > { %s1311_s7 = smov 128   ;;  %s1312_s28 = smov 8  }
  0x24   : > { %1032 = dma.hbm_to_vmem [thread:$0]  (!%p1411_p6), %s233_s10, 2048, %s235_s12, %s1420_s17, %s1311_s7, %s1311_s7, %s1312_s28  }
  0x25   : > { %s1434_s9 = sadd.s32 4294967295, %s1308_s23   ;;  %p102_p1 = scmp.ne.s32.totalorder %s1292_s19, %s1288_s18 }
  0x26   : > { %p103_p2 = scmp.eq.s32.totalorder %s1434_s9, 0  ;;  %p825_p3 = scmp.ge.s32.totalorder %s1308_s23, 1 }
  0x27   : > { %p191_p4 = scmp.lt.s32.totalorder %s1308_s23, 3  ;;  %s1313_s10 = smov [#allocation4]  }
  0x28   : > { %p1443_p5 = por %p103_p2, %p102_p1  ;;  %s206_s12 = sshll.u32 %s1313_s10, 4  ;;  %s1451_s12 = int_to_ptr.vmem [resolvable:$true] %s206_s12 }
  0x29   : > { %p1447_p8 = pnand %p825_p3, %p191_p4  ;;  %s248_s18 = scalar_lea.vmem [#allocation9], %s1402_s6 }
  0x2a   : > { %s255_s15 = sshll.u32 %s248_s18, 4  ;;  %s1314_s27 = smov [#allocation9]   ;;  %s256_s15 = int_to_ptr.vmem [resolvable:$true] %s255_s15 }
  0x2b   : > { %p1025_p9 = pneg %p1447_p8  ;;  %s1153_s26 = scalar_lea.vmem %s256_s15, 2048 }
  0x2c   : > { %p1154_p11 = scmp.ne.s32.totalorder %s256_s15, %s1153_s26  ;;  %s1158_s8 = sshll.u32 %s1314_s27, 4  ;;  %s1159_s8 = int_to_ptr.vmem [resolvable:$false] %s1158_s8 }
  0x2d   : > { %p1458_p10 = pnand %p1025_p9, %p103_p2  ;;  %s1160_s10 = scalar_lea.vmem %s1159_s8, 4096 }
  0x2e   : > { %p1156_p12 = pnand %p1154_p11, %p1114_p7  ;;  %p1161_p0 = scmp.lt.s32.totalorder %s256_s15, %s1159_s8 }
  0x2f   : > { %p1162_p1 = scmp.lt.s32.totalorder %s1160_s10, %s1153_s26 }
  0x30   : > { %p1157_p13 = pneg %p1156_p12 }
  0x31   : > { %p1163_p3 = por %p1162_p1, %p1161_p0 }
  0x33   : > { %p1164_p4 = pnand %p1163_p3, %p1157_p13 }
  0x35   : > { %1167 = shalt.err (!%p1164_p4)
}
  0x36   : > { %1035 = dma.hbm_to_vmem [thread:$0]  (!%p1411_p6), %s1418_s16, 2048, %s256_s15, %s1420_s17, %s1311_s7, %s1311_s7, %s1312_s28  }
  0x37   : > { %s835_s18 = sshll.u32 %s1304_s22, 7  ;;  %p1170_p9 = pneg %p1458_p10 }
  0x38   : > { %s1179_s26 = scalar_lea.vmem %s1451_s12, 256  ;;  %p1187_p0 = scmp.lt.s32.totalorder %s1451_s12, %s1451_s12 }
  0x39   : > { %p1180_p11 = scmp.ne.s32.totalorder %s1451_s12, %s1179_s26  ;;  %p1188_p1 = scmp.lt.s32.totalorder %s1179_s26, %s1179_s26 }
  0x3b   : > { %p1182_p12 = pnand %p1180_p11, %p1170_p9  ;;  %p1189_p3 = por %p1188_p1, %p1187_p0 }
  0x3d   : > { %p1183_p13 = pneg %p1182_p12 }
  0x3f   : > { %p1190_p4 = pnand %p1189_p3, %p1183_p13 }
  0x41   : > { %1193 = shalt.err (!%p1190_p4)
}
  0x42   : > { %1028 = dma.hbm_to_vmem [thread:$0]  (!%p1458_p10), %s1606_s0, 256, %s1451_s12, [#allocation5], %s1311_s7, %s1311_s7, %s1312_s28  }
  0x43   : > { %s274_s8 = scalar_lea.hbm %s1610_s4, %s835_s18  ;;  %s269_s10 = scalar_lea.vmem [#allocation10], %s1402_s6 }
  0x44   : > { %s275_s26 = sshll.u32 %s269_s10, 4  ;;  %s266_s25 = scalar_lea.sflag [#allocation11], %s225_s29  ;;  %s276_s26 = int_to_ptr.vmem [resolvable:$true] %s275_s26 }
  0x45   : > { %s1207_s2 = scalar_lea.vmem %s276_s26, 2048  ;;  %s1315_s16 = smov [#allocation10]  }
  0x46   : > { %p1208_p9 = scmp.ne.s32.totalorder %s276_s26, %s1207_s2  ;;  %s1212_s17 = sshll.u32 %s1315_s16, 4  ;;  %s1213_s17 = int_to_ptr.vmem [resolvable:$false] %s1212_s17 }
  0x47   : > { %s1214_s3 = scalar_lea.vmem %s1213_s17, 4096  ;;  %p1215_p10 = scmp.lt.s32.totalorder %s276_s26, %s1213_s17 }
  0x48   : > { %p1210_p11 = pnand %p1208_p9, %p1114_p7  ;;  %p1216_p13 = scmp.lt.s32.totalorder %s1214_s3, %s1207_s2 }
  0x4a   : > { %p1211_p12 = pneg %p1210_p11  ;;  %p1217_p0 = por %p1216_p13, %p1215_p10 }
  0x4c   : > { %p1218_p1 = pnand %p1217_p0, %p1211_p12 }
  0x4e   : > { %1221 = shalt.err (!%p1218_p1)
}
  0x4f   : > { %s1316_s6 = smov 256   ;;  %287 = sbr.rel (%p1447_p8) target bundleno = 788 (0x314), region = 40 }
  0x50   : > { %1038 = dma.hbm_to_vmem [thread:$0]  (!%p1411_p6), %s274_s8, 2048, %s276_s26, %s266_s25, %s1316_s6, %s1311_s7, %s1312_s28  }
  0x54   : > { %1271 = dma.done.wait (%p103_p2), [#allocation5], 256  }
  0x55   : > { %1273 = vsyncadd (%p103_p2), [#allocation5], 4294967040  ;;  %s293_s2 = sand.u32 1, %s1434_s9   ;;  %s295_s3 = sand.u32 1, %s1292_s19  }
  0x56   : > { %s838_s29 = sshll.u32 %s295_s3, 7  ;;  %s294_s12 = scalar_lea.sflag [#allocation8], %s293_s2 }
  0x57   : > { %s1509_s13 = scalar_lea.vmem [#allocation7], %s838_s29 }
  0x58   : > { %1275 = dma.done.wait (%p1443_p5), %s294_s12, 4096  }
  0x59   : > { %1277 = vsyncadd (%p1443_p5), %s294_s12, 4294963200  ;;  %s1515_s7 = scalar_lea.vmem [#allocation9], %s838_s29  ;;  %s312_s28 = scalar_lea.sflag [#allocation11], %s295_s3 }
  0x5a   : > { %s1517_s14 = scalar_lea.vmem [#allocation10], %s838_s29 }
  0x5b   : > { %1279 = dma.done.wait (%p1443_p5), %s312_s28, 2048  }
  0x5c   : > { %1281 = vsyncadd (%p1443_p5), %s312_s28, 4294965248  ;;  %p841_p6 = scmp.ne.s32.totalorder %s1300_s21, 0 }
  0x5e   : > { %354 = sbr.rel (%p841_p6) target bundleno = 267 (0x10b), region = 60 }
  0x63   : > { %v355_v0 = vld [vmem:[#allocation4] sm:$0xff]  ;;  %v356_v1 = vld [vmem:[#allocation4 + $0x8] sm:$0xff]  ;;  %v1317_v4 = vmov 0.0  }
  0x64   : > { %v357_v2 = vmul.f32 %v355_v0, %v355_v0  ;;  %v358_v3 = vmul.f32 %v356_v1, %v356_v1  ;;  %383 = vst [vmem:[#allocation3 + $0x8] sm:$0xff] %v1317_v4  ;;  %384 = vst [vmem:[#allocation3] sm:$0xff] %v1317_v4  ;;  %v842_v11 = vld [vmem:[%s1607_s1] ss:$0 sm:$0xff] }
  0x66   : > { %359 = vadd.xlane.f32.xlu0 %v357_v2 }
  0x6a   : > { %361 = vadd.xlane.f32.xlu0 %v358_v3 }
  0xef   : > { %v360_v5 = vpop.xlane.xlu0 %359 }
  0xf0   : > { %v364_v6 = vmul.f32 0.0078125, %v360_v5 }
  0xf2   : > { %v367_v7 = vadd.f32 1e-06, %v364_v6 }
  0xf3   : > { %v362_v8 = vpop.xlane.xlu0 %361 }
  0xf4   : > { %1100 = vrsqrt.f32 %v367_v7  ;;  %v365_v9 = vmul.f32 0.0078125, %v362_v8 }
  0xf6   : > { %v368_v10 = vadd.f32 1e-06, %v365_v9 }
  0xf8   : > { %1102 = vrsqrt.f32 %v368_v10 }
 0x101   : > { %v1101_v12 = vpop.eup %1100 }
 0x102   : > { %v377_v13 = vmul.f32 %v1101_v12, %v842_v11 }
 0x104   : > { %v379_v14 = vmul.f32 %v377_v13, %v355_v0 }
 0x105   : > { %v1103_v15 = vpop.eup %1102 }
 0x106   : > { %381 = vst [vmem:[#allocation2] sm:$0xff] %v379_v14  ;;  %v378_v16 = vmul.f32 %v1103_v15, %v842_v11 }
 0x108   : > { %v380_v17 = vmul.f32 %v378_v16, %v356_v1 }
 0x10a   : > { %382 = vst [vmem:[#allocation2 + $0x8] sm:$0xff] %v380_v17 }
 0x10b PF: > { %v493_v18 = vld [vmem:[%s1515_s7 + $0x78] sm:$0xff]  ;;  %v492_v19 = vld [vmem:[%s1515_s7 + $0x70] sm:$0xff]  ;;  %v491_v22 = vld [vmem:[%s1515_s7 + $0x68] sm:$0xff]  ;;  %p845_p7 = scmp.ne.s32.totalorder %s1300_s21, 1 }
 0x10c   : > { %941 = vmatprep.subr.mxu1 %v493_v18  ;;  %v402_v20 = vld [vmem:[%s1509_s13 + $0x78] sm:$0xff]  ;;  %v401_v21 = vld [vmem:[%s1509_s13 + $0x70] sm:$0xff]  ;;  %v400_v23 = vld [vmem:[%s1509_s13 + $0x68] sm:$0xff] }
 0x10d   : > { %942 = vmatpush3.xpose.msra.mxu1 %v493_v18  ;;  %906 = vmatprep.subr.mxu0 %v402_v20  ;;  %v490_v24 = vld [vmem:[%s1515_s7 + $0x60] sm:$0xff]  ;;  %v385_v25 = vld [vmem:[#allocation2] sm:$0xff]  ;;  %v489_v27 = vld [vmem:[%s1515_s7 + $0x58] sm:$0xff] }
 0x10e   : > { %943 = vmatprep.subr.mxu1 %v492_v19  ;;  %907 = vmatpush3.xpose.msra.mxu0 %v402_v20  ;;  %v399_v26 = vld [vmem:[%s1509_s13 + $0x60] sm:$0xff]  ;;  %v398_v28 = vld [vmem:[%s1509_s13 + $0x58] sm:$0xff]  ;;  %v488_v29 = vld [vmem:[%s1515_s7 + $0x50] sm:$0xff] }
 0x10f   : > { %908 = vmatprep.subr.mxu0 %v401_v21  ;;  %973 = vmatprep.mubr.f32.mxu1 %v385_v25  ;;  %v397_v30 = vld [vmem:[%s1509_s13 + $0x50] sm:$0xff]  ;;  %v487_v31 = vld [vmem:[%s1515_s7 + $0x48] sm:$0xff]  ;;  %v486_v33 = vld [vmem:[%s1515_s7 + $0x40] sm:$0xff] }
 0x110   : > { %938 = vmatprep.mubr.f32.mxu0 %v385_v25  ;;  %v396_v32 = vld [vmem:[%s1509_s13 + $0x48] sm:$0xff]  ;;  %v395_v34 = vld [vmem:[%s1509_s13 + $0x40] sm:$0xff]  ;;  %v485_v35 = vld [vmem:[%s1515_s7 + $0x38] sm:$0xff] }
 0x111   : > { %944 = vmatpush3.xpose.msra.mxu1 %v492_v19  ;;  %v394_v36 = vld [vmem:[%s1509_s13 + $0x38] sm:$0xff]  ;;  %v484_v37 = vld [vmem:[%s1515_s7 + $0x30] sm:$0xff]  ;;  %v483_v39 = vld [vmem:[%s1515_s7 + $0x28] sm:$0xff] }
 0x112   : > { %945 = vmatprep.subr.mxu1 %v491_v22  ;;  %909 = vmatpush3.xpose.msra.mxu0 %v401_v21  ;;  %v393_v38 = vld [vmem:[%s1509_s13 + $0x30] sm:$0xff]  ;;  %v392_v40 = vld [vmem:[%s1509_s13 + $0x28] sm:$0xff]  ;;  %v482_v41 = vld [vmem:[%s1515_s7 + $0x20] sm:$0xff] }
 0x113   : > { %910 = vmatprep.subr.mxu0 %v400_v23  ;;  %v391_v42 = vld [vmem:[%s1509_s13 + $0x20] sm:$0xff]  ;;  %v481_v43 = vld [vmem:[%s1515_s7 + $0x18] sm:$0xff]  ;;  %v480_v45 = vld [vmem:[%s1515_s7 + $0x10] sm:$0xff] }
 0x114   : > { %v390_v44 = vld [vmem:[%s1509_s13 + $0x18] sm:$0xff]  ;;  %v389_v46 = vld [vmem:[%s1509_s13 + $0x10] sm:$0xff]  ;;  %v479_v47 = vld [vmem:[%s1515_s7 + $0x8] sm:$0xff] }
 0x115   : > { %946 = vmatpush3.xpose.msra.mxu1 %v491_v22  ;;  %v388_v48 = vld [vmem:[%s1509_s13 + $0x8] sm:$0xff]  ;;  %v478_v49 = vld [vmem:[%s1515_s7] sm:$0xff]  ;;  %v386_v51 = vld [vmem:[#allocation2 + $0x8] sm:$0xff] }
 0x116   : > { %947 = vmatprep.subr.mxu1 %v490_v24  ;;  %911 = vmatpush3.xpose.msra.mxu0 %v400_v23  ;;  %v387_v50 = vld [vmem:[%s1509_s13] sm:$0xff]  ;;  %v602_v52 = vld [vmem:[%s1517_s14 + $0x78] sm:$0xff]  ;;  %v601_v53 = vld [vmem:[%s1517_s14 + $0x70] sm:$0xff] }
 0x117   : > { %912 = vmatprep.subr.mxu0 %v399_v26  ;;  %v600_v54 = vld [vmem:[%s1517_s14 + $0x68] sm:$0xff]  ;;  %v599_v55 = vld [vmem:[%s1517_s14 + $0x60] sm:$0xff]  ;;  %v598_v56 = vld [vmem:[%s1517_s14 + $0x58] sm:$0xff] }
 0x118   : > { %v597_v57 = vld [vmem:[%s1517_s14 + $0x50] sm:$0xff]  ;;  %v596_v58 = vld [vmem:[%s1517_s14 + $0x48] sm:$0xff]  ;;  %v595_v59 = vld [vmem:[%s1517_s14 + $0x40] sm:$0xff] }
 0x119   : > { %948 = vmatpush3.xpose.msra.mxu1 %v490_v24  ;;  %v594_v60 = vld [vmem:[%s1517_s14 + $0x38] sm:$0xff]  ;;  %v593_v61 = vld [vmem:[%s1517_s14 + $0x30] sm:$0xff]  ;;  %v592_v62 = vld [vmem:[%s1517_s14 + $0x28] sm:$0xff] }
 0x11a   : > { %949 = vmatprep.subr.mxu1 %v489_v27  ;;  %913 = vmatpush3.xpose.msra.mxu0 %v399_v26  ;;  %v591_v63 = vld [vmem:[%s1517_s14 + $0x20] sm:$0xff]  ;;  %v590_v0 = vld [vmem:[%s1517_s14 + $0x18] sm:$0xff]  ;;  %v589_v1 = vld [vmem:[%s1517_s14 + $0x10] sm:$0xff] }
 0x11b   : > { %914 = vmatprep.subr.mxu0 %v398_v28  ;;  %v588_v2 = vld [vmem:[%s1517_s14 + $0x8] sm:$0xff]  ;;  %v587_v3 = vld [vmem:[%s1517_s14] sm:$0xff] }
 0x11c   : > { %v586_v20 = vld [vmem:[#allocation3] sm:$0xff]  ;;  %v585_v22 = vld [vmem:[#allocation3 + $0x8] sm:$0xff] }
 0x11d   : > { %950 = vmatpush3.xpose.msra.mxu1 %v489_v27 }
 0x11e   : > { %951 = vmatprep.subr.mxu1 %v488_v29  ;;  %915 = vmatpush3.xpose.msra.mxu0 %v398_v28 }
 0x11f   : > { %916 = vmatprep.subr.mxu0 %v397_v30 }
 0x121   : > { %952 = vmatpush3.xpose.msra.mxu1 %v488_v29 }
 0x122   : > { %953 = vmatprep.subr.mxu1 %v487_v31  ;;  %917 = vmatpush3.xpose.msra.mxu0 %v397_v30 }
 0x123   : > { %918 = vmatprep.subr.mxu0 %v396_v32 }
 0x125   : > { %954 = vmatpush3.xpose.msra.mxu1 %v487_v31 }
 0x126   : > { %955 = vmatprep.subr.mxu1 %v486_v33  ;;  %919 = vmatpush3.xpose.msra.mxu0 %v396_v32 }
 0x127   : > { %920 = vmatprep.subr.mxu0 %v395_v34 }
 0x129   : > { %956 = vmatpush3.xpose.msra.mxu1 %v486_v33 }
 0x12a   : > { %957 = vmatprep.subr.mxu1 %v485_v35  ;;  %921 = vmatpush3.xpose.msra.mxu0 %v395_v34 }
 0x12b   : > { %922 = vmatprep.subr.mxu0 %v394_v36 }
 0x12d   : > { %958 = vmatpush3.xpose.msra.mxu1 %v485_v35 }
 0x12e   : > { %959 = vmatprep.subr.mxu1 %v484_v37  ;;  %923 = vmatpush3.xpose.msra.mxu0 %v394_v36 }
 0x12f   : > { %924 = vmatprep.subr.mxu0 %v393_v38 }
 0x131   : > { %960 = vmatpush3.xpose.msra.mxu1 %v484_v37 }
 0x132   : > { %961 = vmatprep.subr.mxu1 %v483_v39  ;;  %925 = vmatpush3.xpose.msra.mxu0 %v393_v38 }
 0x133   : > { %926 = vmatprep.subr.mxu0 %v392_v40 }
 0x135   : > { %962 = vmatpush3.xpose.msra.mxu1 %v483_v39 }
 0x136   : > { %963 = vmatprep.subr.mxu1 %v482_v41  ;;  %927 = vmatpush3.xpose.msra.mxu0 %v392_v40 }
 0x137   : > { %928 = vmatprep.subr.mxu0 %v391_v42 }
 0x139   : > { %964 = vmatpush3.xpose.msra.mxu1 %v482_v41 }
 0x13a   : > { %965 = vmatprep.subr.mxu1 %v481_v43  ;;  %929 = vmatpush3.xpose.msra.mxu0 %v391_v42 }
 0x13b   : > { %930 = vmatprep.subr.mxu0 %v390_v44 }
 0x13d   : > { %966 = vmatpush3.xpose.msra.mxu1 %v481_v43 }
 0x13e   : > { %967 = vmatprep.subr.mxu1 %v480_v45  ;;  %931 = vmatpush3.xpose.msra.mxu0 %v390_v44 }
 0x13f   : > { %932 = vmatprep.subr.mxu0 %v389_v46 }
 0x141   : > { %968 = vmatpush3.xpose.msra.mxu1 %v480_v45 }
 0x142   : > { %969 = vmatprep.subr.mxu1 %v479_v47  ;;  %933 = vmatpush3.xpose.msra.mxu0 %v389_v46 }
 0x143   : > { %934 = vmatprep.subr.mxu0 %v388_v48 }
 0x145   : > { %970 = vmatpush3.xpose.msra.mxu1 %v479_v47 }
 0x146   : > { %971 = vmatprep.subr.mxu1 %v478_v49  ;;  %935 = vmatpush3.xpose.msra.mxu0 %v388_v48 }
 0x147   : > { %936 = vmatprep.subr.mxu0 %v387_v50 }
 0x149   : > { %972 = vmatpush3.xpose.msra.mxu1 %v478_v49 }
 0x14a   : > { %937 = vmatpush3.xpose.msra.mxu0 %v387_v50 }
 0x14b   : > { %976 = vmatprep.subr.mxu0 %v602_v52 }
 0x14c   : > { %974 = vmatmul.mubr.f32.vlgmr.msra.gmra.mxu1 %v386_v51 }
 0x14d   : > { %939 = vmatmul.mubr.f32.vlgmr.msra.gmra.mxu0 %v386_v51 }
 0x14e   : > { %977 = vmatpush3.xpose.msra.mxu0 %v602_v52 }
 0x14f   : > { %978 = vmatprep.subr.mxu0 %v601_v53 }
 0x152   : > { %979 = vmatpush3.xpose.msra.mxu0 %v601_v53 }
 0x153   : > { %980 = vmatprep.subr.mxu0 %v600_v54 }
 0x156   : > { %981 = vmatpush3.xpose.msra.mxu0 %v600_v54 }
 0x157   : > { %982 = vmatprep.subr.mxu0 %v599_v55 }
 0x15a   : > { %983 = vmatpush3.xpose.msra.mxu0 %v599_v55 }
 0x15b   : > { %984 = vmatprep.subr.mxu0 %v598_v56 }
 0x15e   : > { %985 = vmatpush3.xpose.msra.mxu0 %v598_v56 }
 0x15f   : > { %986 = vmatprep.subr.mxu0 %v597_v57 }
 0x162   : > { %987 = vmatpush3.xpose.msra.mxu0 %v597_v57 }
 0x163   : > { %988 = vmatprep.subr.mxu0 %v596_v58 }
 0x166   : > { %989 = vmatpush3.xpose.msra.mxu0 %v596_v58 }
 0x167   : > { %990 = vmatprep.subr.mxu0 %v595_v59 }
 0x16a   : > { %991 = vmatpush3.xpose.msra.mxu0 %v595_v59 }
 0x16b   : > { %992 = vmatprep.subr.mxu0 %v594_v60 }
 0x16e   : > { %993 = vmatpush3.xpose.msra.mxu0 %v594_v60 }
 0x16f   : > { %994 = vmatprep.subr.mxu0 %v593_v61 }
 0x172   : > { %995 = vmatpush3.xpose.msra.mxu0 %v593_v61 }
 0x173   : > { %996 = vmatprep.subr.mxu0 %v592_v62 }
 0x176   : > { %997 = vmatpush3.xpose.msra.mxu0 %v592_v62 }
 0x177   : > { %998 = vmatprep.subr.mxu0 %v591_v63 }
 0x17a   : > { %999 = vmatpush3.xpose.msra.mxu0 %v591_v63 }
 0x17b   : > { %1000 = vmatprep.subr.mxu0 %v590_v0 }
 0x17e   : > { %1001 = vmatpush3.xpose.msra.mxu0 %v590_v0 }
 0x17f   : > { %1002 = vmatprep.subr.mxu0 %v589_v1 }
 0x182   : > { %1003 = vmatpush3.xpose.msra.mxu0 %v589_v1 }
 0x183   : > { %1004 = vmatprep.subr.mxu0 %v588_v2 }
 0x186   : > { %1005 = vmatpush3.xpose.msra.mxu0 %v588_v2 }
 0x187   : > { %1006 = vmatprep.subr.mxu0 %v587_v3 }
 0x18a   : > { %1007 = vmatpush3.xpose.msra.mxu0 %v587_v3 }
 0x20c   : > { %v975_v4 = vpop.f32.mrf.mxu1 }
 0x20d   : > { %v844_v5 = vmul.f32 -1.442695, %v975_v4  ;;  %v940_v13 = vpop.f32.mrf.mxu0 }
 0x20e   : > { %v560_v6 = vpop.f32.mrf.mxu1 }
 0x20f   : > { %1104 = vpow2.f32 %v844_v5  ;;  %v843_v7 = vmul.f32 -1.442695, %v560_v6  ;;  %v469_v17 = vpop.f32.mrf.mxu0 }
 0x211   : > { %1106 = vpow2.f32 %v843_v7 }
 0x21c   : > { %v1105_v8 = vpop.eup %1104 }
 0x21d   : > { %v576_v9 = vadd.f32 1.0, %v1105_v8 }
 0x21e   : > { %v1107_v10 = vpop.eup %1106 }
 0x21f   : > { %1108 = vrcp.f32 %v576_v9  ;;  %v575_v11 = vadd.f32 1.0, %v1107_v10 }
 0x221   : > { %1110 = vrcp.f32 %v575_v11 }
 0x22c   : > { %v1109_v12 = vpop.eup %1108 }
 0x22d   : > { %v582_v15 = vmul.f32 %v1109_v12, %v975_v4 }
 0x22e   : > { %v1111_v14 = vpop.eup %1110 }
 0x22f   : > { %v581_v16 = vmul.f32 %v1111_v14, %v560_v6  ;;  %v584_v19 = vmul.f32 %v940_v13, %v582_v15 }
 0x231   : > { %v583_v18 = vmul.f32 %v581_v16, %v469_v17 }
 0x233   : > { %1008 = vmatprep.mubr.f32.mxu0 %v583_v18 }
 0x234   : > { %1009 = vmatmul.mubr.f32.vlgmr.msra.gmra.mxu0 %v584_v19 }
 0x2f4   : > { %v1010_v21 = vpop.f32.mrf.mxu0 }
 0x2f5   : > { %v679_v23 = vadd.f32 %v1010_v21, %v586_v20  ;;  %685 = sbr.rel (%p845_p7) target bundleno = 772 (0x304), region = 64 }
 0x2f6   : > { %v669_v24 = vpop.f32.mrf.mxu0 }
 0x2f7   : > { %681 = vst [vmem:[#allocation3] sm:$0xff] %v679_v23  ;;  %v678_v25 = vadd.f32 %v669_v24, %v585_v22 }
 0x2f9   : > { %680 = vst [vmem:[#allocation3 + $0x8] sm:$0xff] %v678_v25 }
 0x2fa   : > { %v688_v27 = vld [vmem:[#allocation4] sm:$0xff]  ;;  %v689_v30 = vld [vmem:[#allocation4 + $0x8] sm:$0xff] }
 0x2fe   : > { %v687_v28 = vld [vmem:[#allocation3] sm:$0xff] }
 0x2ff   : > { %v691_v31 = vadd.f32 %v689_v30, %v687_v28 }
 0x300   : > { %v686_v26 = vld [vmem:[#allocation3 + $0x8] sm:$0xff] }
 0x301   : > { %v690_v29 = vadd.f32 %v688_v27, %v686_v26  ;;  %693 = vst [vmem:[#allocation12 + $0x8] sm:$0xff] %v691_v31 }
 0x303   : > { %692 = vst [vmem:[#allocation12] sm:$0xff] %v690_v29 }
 0x304 PF: > { %p1042_p2 = scmp.eq.s32.totalorder %s1434_s9, 1  ;;  %s1318_s15 = smov [#allocation12]  }
 0x305   : > { %s703_s27 = sshll.u32 %s1318_s15, 4  ;;  %s704_s27 = int_to_ptr.vmem [resolvable:$true] %s703_s27 }
 0x306   : > { %s1222_s8 = scalar_lea.vmem %s704_s27, 256  ;;  %p1229_p4 = scmp.lt.s32.totalorder %s704_s27, %s704_s27 }
 0x307   : > { %p1223_p5 = scmp.ne.s32.totalorder %s704_s27, %s1222_s8  ;;  %p1230_p9 = scmp.lt.s32.totalorder %s1222_s8, %s1222_s8 }
 0x309   : > { %p1224_p8 = pnand %p1223_p5, %p1042_p2  ;;  %p1231_p11 = por %p1230_p9, %p1229_p4 }
 0x30b   : > { %p1225_p3 = pneg %p1224_p8 }
 0x30d   : > { %p1232_p12 = pnand %p1231_p11, %p1225_p3 }
 0x30f   : > { %1235 = shalt.err (!%p1232_p12)
}
 0x310   : > { %s1319_s21 = smov 128   ;;  %s1320_s10 = smov 8  }
 0x311   : > { %1022 = dma.vmem_to_hbm [thread:$0]  (%p1042_p2), %s704_s27, 256, %s1611_s5, [#allocation6], %s1319_s21, %s1319_s21, %s1320_s10  }
 0x312   : > { %1283 = dma.done.wait (%p1042_p2), [#allocation6], 256  }
 0x313   : > { %1285 = vsyncadd (%p1042_p2), [#allocation6], 4294967040 }
 0x314 PF: > { %s23_s23 = sadd.s32 1, %s1308_s23   ;;  %s1621_s18 = smov %s1292_s19 }
 0x315   : > { %p20_p10 = scmp.ge.s32.totalorder %s23_s23, 4   ;;  %s1622_s19 = smov %s1296_s20 }
 0x316   : > { %s1623_s20 = smov %s1398_s30  ;;  %s1624_s21 = smov %s1304_s22 }
 0x317   : > { %s1625_s22 = smov %s1627_s24  ;;  %22 = sbr.rel (!%p20_p10) target bundleno = 11 (0xb), region = 116 }
 0x31c   :  { %719 = vsyncpa [#allocation5], 1 }
 0x31d   :  { %721 = vsyncpa [#allocation5 + $0x1], 1 }
 0x31e   :  { %722 = vsyncpa [#allocation8], 1 }
 0x31f   :  { %724 = vsyncpa [#allocation8 + $0x1], 1 }
 0x320   :  { %725 = vsyncpa [#allocation11], 1 }
 0x321   :  { %727 = vsyncpa [#allocation11 + $0x1], 1 }
 0x322   :  { %728 = vsyncpa [#allocation6], 1 }
 0x323   :  { %730 = vsyncpa [#allocation6 + $0x1], 1 }

</bundles_post_ra>
